<compile_context>
chip_gen: v6e
topology: v6e:2x2x1
jax: 0.10.0
libtpu: 0.0.40
codegen_flags: <defaults>
</compile_context>

<pallas_src>
import math

import jax
import jax.numpy as jnp
import numpy as np
from jax import lax
from jax.experimental import pallas as pl
from jax.experimental.pallas import tpu as pltpu


# --------------------------------------------------------------------------
# kernel
# --------------------------------------------------------------------------
def _make_kernel(TB, L):
    L4 = L // 4

    def conv1d_relu_bf16(x3, w_ref, b_ref):
        """x3: (P, TB, Cin) bf16 position-major; w_ref: (3, Cin, Cout) bf16.

        relu(conv1d_same(x) + b), returned as bf16 (P, TB, Cout).
        Shifted taps are leading-axis slices + zero pads (no cross-sequence
        leakage, no relayout); taps accumulate as three MXU dots into f32."""
        P, _, Cin = x3.shape
        zeros = jnp.zeros((1, TB, Cin), x3.dtype)
        x_prev = jnp.concatenate([zeros, x3[:-1]], axis=0)   # x_prev[p] = x[p-1]
        x_next = jnp.concatenate([x3[1:], zeros], axis=0)    # x_next[p] = x[p+1]

        def tap(xt, k):
            return jnp.dot(xt.reshape(P * TB, Cin), w_ref[k],
                           preferred_element_type=jnp.float32)

        acc = tap(x_prev, 0) + tap(x3, 1) + tap(x_next, 2)   # (P*TB, Cout) f32
        h = jnp.maximum(acc + b_ref[...], 0.0)               # bias+relu in f32
        cout = h.shape[-1]
        return h.astype(jnp.bfloat16).reshape(P, TB, cout)

    def maxpool2(x3):
        """(P, TB, C) -> (P//2, TB, C): max over adjacent position pairs.

        Leading-dim split reshape + static index -> layout-preserving."""
        P, _, C = x3.shape
        x4 = x3.reshape(P // 2, 2, TB, C)
        return jnp.maximum(x4[:, 0], x4[:, 1])

    def kernel(emb_ref, w1_ref, b1_ref, w2_ref, b2_ref, wfc_ref, bfc_ref,
               out_ref, h_scr):
        x = emb_ref[...]                            # (L,   TB, E)   bf16
        h = conv1d_relu_bf16(x, w1_ref, b1_ref)     # (L,   TB, 128) bf16
        h = maxpool2(h)                             # (L/2, TB, 128)
        h = conv1d_relu_bf16(h, w2_ref, b2_ref)     # (L/2, TB, 64)
        h = maxpool2(h)                             # (L/4, TB, 64)
        # nn.Dropout(0.5) is identity in eval mode; nothing to do.

        # FC: logits[b] = sum_p h[p, b, :] @ W_p  — L4 accumulated small dots,
        # everything stays position-major (no flatten / relayout).
        h_scr[...] = h                              # bf16 scratch (L4, TB, 64)

        def fc_body(p, acc):
            xp = h_scr[p]                           # (TB, 64)     bf16
            wp = wfc_ref[p]                         # (64, NC_pad) bf16
            return acc + jnp.dot(xp, wp, preferred_element_type=jnp.float32)

        logits = lax.fori_loop(0, L4, fc_body,
                               jnp.zeros(out_ref.shape, jnp.float32))
        out_ref[...] = (logits + bfc_ref[...]).astype(out_ref.dtype)

    return kernel


# --------------------------------------------------------------------------
# tile sizing
# --------------------------------------------------------------------------
def _per_elem_vmem_bytes(L, E, C1, C2):
    """Rough upper bound of simultaneously-live VMEM bytes per batch element."""
    bf2, f4 = 2, 4
    b = 0
    b += 2 * L * E * bf2          # double-buffered bf16 input block
    b += 2 * L * E * bf2          # shifted copies (x_prev, x_next) for conv1
    b += L * C1 * f4              # conv1 f32 accumulator
    b += L * C1 * bf2             # conv1 activations, bf16
    b += 3 * (L // 2) * C1 * bf2  # pooled1 + shifted copies for conv2
    b += (L // 2) * C2 * f4       # conv2 f32 accumulator
    b += 2 * (L // 4) * C2 * bf2  # pooled2 + FC scratch
    return b


def _pick_batch_tile(B, per_elem_bytes, budget_bytes):
    """Batch tile: multiple of 16 (clean bf16 sublane packing), sized by a VMEM
    byte budget, preferring >=2 grid steps (v7x has two TensorCores) and
    minimal batch padding.  Caller pads B up to a multiple of the tile."""
    cap = (budget_bytes // max(per_elem_bytes, 1)) // 16 * 16
    cap = int(max(16, min(cap, 1024)))
    if B <= 16:
        return 16
    # keep at least 2 grid steps so the "parallel" batch axis can be split
    # across v7x's two TensorCores (no effect on v5e/v6e single-TC chips)
    cap = min(cap, max(16, (B // 2) // 16 * 16))
    best_tb, best_waste = None, None
    for tb in range(cap, 15, -16):
        waste = (-B) % tb
        if best_waste is None or waste < best_waste:
            best_tb, best_waste = tb, waste
        if waste == 0:          # largest divisor <= cap
            break
    return best_tb


# --------------------------------------------------------------------------
# wrapper
# --------------------------------------------------------------------------
def dynamic_cnn_forward(token_ids, params, *, vmem_budget_bytes=20 << 20):
    emb_table, w1, b1, w2, b2, wfc, bfc = params
    B, L = token_ids.shape
    E = emb_table.shape[1]
    C1 = w1.shape[0]                      # 128
    C2 = w2.shape[0]                      # 64
    n_classes = bfc.shape[0]
    assert L % 4 == 0, "max_seq_length must be divisible by 4 (two maxpool2)"
    L4 = L // 4

    # Batch tile from a VMEM byte budget; pad B up to a tile multiple.
    per_b = _per_elem_vmem_bytes(L, E, C1, C2)
    TB = _pick_batch_tile(B, per_b, vmem_budget_bytes)
    B_pad = -(-B // TB) * TB
    if B_pad != B:
        token_ids = jnp.pad(token_ids, ((0, B_pad - B), (0, 0)))

    # Pad class dim to 128 lanes -> unmasked, lane-dense output stores.
    NC_pad = ((n_classes + 127) // 128) * 128

    # ---- glue (plain JAX): bf16 embedding gather, position-major ----
    # TODO(synk): fuse the embedding gather in-kernel (scalar-prefetch ids +
    # resident VMEM table) once the in-kernel gather lowering is validated;
    # the bf16 XLA gather already halves the activation HBM traffic vs f32.
    embedded = jnp.take(emb_table.astype(jnp.bfloat16), token_ids.T, axis=0)
    # embedded: (L, B_pad, E) bf16, position-major.

    # Conv weights: (Cout, Cin, K) -> (K, Cin, Cout), bf16.
    w1_t = jnp.transpose(w1, (2, 1, 0)).astype(jnp.bfloat16)     # (3, E,  C1)
    w2_t = jnp.transpose(w2, (2, 1, 0)).astype(jnp.bfloat16)     # (3, C1, C2)
    b1_r = b1.reshape(1, C1).astype(jnp.float32)
    b2_r = b2.reshape(1, C2).astype(jnp.float32)
    # FC weight: torch flatten index = c*L4 + p  ->  (L4, C2, NC_pad).
    wfc_r = jnp.transpose(wfc.reshape(n_classes, C2, L4), (2, 1, 0))
    wfc_r = jnp.pad(wfc_r, ((0, 0), (0, 0), (0, NC_pad - n_classes)))
    wfc_r = wfc_r.astype(jnp.bfloat16)
    bfc_r = jnp.pad(bfc, (0, NC_pad - n_classes)).reshape(1, NC_pad)
    bfc_r = bfc_r.astype(jnp.float32)

    kernel = _make_kernel(TB, L)

    # vmem_limit: 32 MiB covers the default budget with headroom; raising the
    # budget (e.g. on v6e's 128 MiB VMEM) raises the limit with it.  Keep well
    # under v7x's 64 MiB physical VMEM.
    vmem_limit = min(max(32 << 20, vmem_budget_bytes + (12 << 20)), 60 << 20)

    out = pl.pallas_call(
        kernel,
        out_shape=jax.ShapeDtypeStruct((B_pad, NC_pad), jnp.float32),
        grid_spec=pltpu.PrefetchScalarGridSpec(
            num_scalar_prefetch=0,
            grid=(B_pad // TB,),
            in_specs=[
                pl.BlockSpec((L, TB, E), lambda b: (0, b, 0)),        # activations
                pl.BlockSpec((3, E, C1), lambda b: (0, 0, 0)),        # conv1 w
                pl.BlockSpec((1, C1), lambda b: (0, 0)),              # conv1 b
                pl.BlockSpec((3, C1, C2), lambda b: (0, 0, 0)),       # conv2 w
                pl.BlockSpec((1, C2), lambda b: (0, 0)),              # conv2 b
                pl.BlockSpec((L4, C2, NC_pad), lambda b: (0, 0, 0)),  # fc w
                pl.BlockSpec((1, NC_pad), lambda b: (0, 0)),          # fc b
            ],
            out_specs=pl.BlockSpec((TB, NC_pad), lambda b: (b, 0)),
            scratch_shapes=[pltpu.VMEM((L4, TB, C2), jnp.bfloat16)],
        ),
        compiler_params=pltpu.CompilerParams(
            dimension_semantics=("parallel",),
            vmem_limit_bytes=vmem_limit),
    )(embedded, w1_t, b1_r, w2_t, b2_r, wfc_r, bfc_r)

    return out[:B, :n_classes]


# --------------------------------------------------------------------------
# reference (pure JAX, f32) + params
# --------------------------------------------------------------------------
def reference_forward(token_ids, params):
    emb_table, w1, b1, w2, b2, wfc, bfc = params
    x = jnp.take(emb_table, token_ids, axis=0)          # (B, L, E)
    x = jnp.transpose(x, (0, 2, 1))                     # (B, E, L)

    def conv(x, w, b):
        y = jax.lax.conv_general_dilated(
            x, w, window_strides=(1,), padding=((1, 1),),
            dimension_numbers=("NCH", "OIH", "NCH"))
        return y + b[None, :, None]

    def pool(x):
        B_, C_, L_ = x.shape
        return jnp.max(x.reshape(B_, C_, L_ // 2, 2), axis=-1)

    h = pool(jnp.maximum(conv(x, w1, b1), 0.0))
    h = pool(jnp.maximum(conv(h, w2, b2), 0.0))
    flat = h.reshape(h.shape[0], -1)                    # channel-major flatten
    return flat @ wfc.T + bfc


def init_params(key, vocab_size, embedding_dim, n_classes, max_seq_length):
    ks = jax.random.split(key, 7)
    L4 = max_seq_length // 4
    emb_table = jax.random.normal(ks[0], (vocab_size, embedding_dim),
                                  jnp.float32) * 0.1
    w1 = jax.random.normal(ks[1], (128, embedding_dim, 3), jnp.float32) \
        * (1.0 / math.sqrt(embedding_dim * 3))
    b1 = jax.random.normal(ks[2], (128,), jnp.float32) * 0.01
    w2 = jax.random.normal(ks[3], (64, 128, 3), jnp.float32) \
        * (1.0 / math.sqrt(128 * 3))
    b2 = jax.random.normal(ks[4], (64,), jnp.float32) * 0.01
    wfc = jax.random.normal(ks[5], (n_classes, 64 * L4), jnp.float32) \
        * (1.0 / math.sqrt(64 * L4))
    bfc = jax.random.normal(ks[6], (n_classes,), jnp.float32) * 0.01
    return (emb_table, w1, b1, w2, b2, wfc, bfc)


if __name__ == "__main__":
    VOCAB = 50
    EMBED_DIM = 32
    N_CLASSES = 5
    MAX_SEQ_LEN = 16      # must be divisible by 4 (two maxpool(2) stages)
    BATCH = 2

    key = jax.random.PRNGKey(0)
    k_param, k_tok = jax.random.split(key)
    params = init_params(k_param, VOCAB, EMBED_DIM, N_CLASSES, MAX_SEQ_LEN)
    token_ids = jax.random.randint(k_tok, (BATCH, MAX_SEQ_LEN), 0, VOCAB,
                                   dtype=jnp.int32)

    logits = dynamic_cnn_forward(token_ids, params)
    jax.block_until_ready(logits)
    assert logits.shape == (BATCH, N_CLASSES)

    # correctness vs. pure-JAX f32 reference (bf16 activation path -> relaxed tol)
    ref = reference_forward(token_ids, params)
    np.testing.assert_allclose(np.asarray(logits), np.asarray(ref),
                               rtol=5e-2, atol=2e-2)
    print("KERNEL_OK")
</pallas_src>

<mosaic_0001>
module attributes {stable_mosaic.version = 11 : i64} {
  func.func @kernel(%arg0: i32, %arg1: memref<16x16x32xbf16, #tpu.memory_space<vmem>>, %arg2: memref<3x32x128xbf16, #tpu.memory_space<vmem>>, %arg3: memref<1x128xf32, #tpu.memory_space<vmem>>, %arg4: memref<3x128x64xbf16, #tpu.memory_space<vmem>>, %arg5: memref<1x64xf32, #tpu.memory_space<vmem>>, %arg6: memref<4x64x128xbf16, #tpu.memory_space<vmem>>, %arg7: memref<1x128xf32, #tpu.memory_space<vmem>>, %arg8: memref<16x128xf32, #tpu.memory_space<vmem>>, %arg9: memref<4x16x64xbf16, #tpu.memory_space<vmem>>) attributes {dimension_semantics = [#tpu.dimension_semantics<parallel>], iteration_bounds = array<i64: 1>, scalar_prefetch = 0 : i64, scratch_operands = 1 : i64, tpu.core_type = #tpu.core_type<tc>, window_params = [{transform_indices = @transform_0, window_bounds = array<i64: 16, 16, 32>}, {pipeline_mode = #tpu.pipeline_mode<synchronous>, transform_indices = @transform_1, window_bounds = array<i64: 3, 32, 128>}, {pipeline_mode = #tpu.pipeline_mode<synchronous>, transform_indices = @transform_2, window_bounds = array<i64: 1, 128>}, {pipeline_mode = #tpu.pipeline_mode<synchronous>, transform_indices = @transform_3, window_bounds = array<i64: 3, 128, 64>}, {pipeline_mode = #tpu.pipeline_mode<synchronous>, transform_indices = @transform_4, window_bounds = array<i64: 1, 64>}, {pipeline_mode = #tpu.pipeline_mode<synchronous>, transform_indices = @transform_5, window_bounds = array<i64: 4, 64, 128>}, {pipeline_mode = #tpu.pipeline_mode<synchronous>, transform_indices = @transform_6, window_bounds = array<i64: 1, 128>}, {transform_indices = @transform_7, window_bounds = array<i64: 16, 128>}]} {
    %c0 = arith.constant 0 : index
    %c0_0 = arith.constant 0 : index
    %c0_1 = arith.constant 0 : index
    %0 = vector.load %arg1[%c0, %c0_0, %c0_1] : memref<16x16x32xbf16, #tpu.memory_space<vmem>>, vector<16x16x32xbf16>
    %cst = arith.constant 0.000000e+00 : bf16
    %1 = vector.broadcast %cst : bf16 to vector<1x16x32xbf16>
    %2 = vector.extract_strided_slice %0 {offsets = [0, 0, 0], sizes = [15, 16, 32], strides = [1, 1, 1]} : vector<16x16x32xbf16> to vector<15x16x32xbf16>
    %3 = tpu.concatenate %1, %2 in 0 : vector<1x16x32xbf16>, vector<15x16x32xbf16> -> vector<16x16x32xbf16>
    %4 = vector.extract_strided_slice %0 {offsets = [1, 0, 0], sizes = [15, 16, 32], strides = [1, 1, 1]} : vector<16x16x32xbf16> to vector<15x16x32xbf16>
    %5 = tpu.concatenate %4, %1 in 0 : vector<15x16x32xbf16>, vector<1x16x32xbf16> -> vector<16x16x32xbf16>
    %6 = vector.shape_cast %3 : vector<16x16x32xbf16> to vector<256x32xbf16>
    %c0_2 = arith.constant 0 : index
    %c0_3 = arith.constant 0 : index
    %c0_4 = arith.constant 0 : index
    %7 = vector.load %arg2[%c0_2, %c0_3, %c0_4] : memref<3x32x128xbf16, #tpu.memory_space<vmem>>, vector<1x32x128xbf16>
    %8 = vector.shape_cast %7 : vector<1x32x128xbf16> to vector<32x128xbf16>
    %cst_5 = arith.constant dense<0.000000e+00> : vector<256x128xf32>
    %9 = tpu.matmul %6, %8, %cst_5 {dimension_numbers = #tpu.dot_dimension_numbers<[1], [0], [0], [1], [0, 0, 1, 1], [], []>} : vector<256x32xbf16>, vector<32x128xbf16>, vector<256x128xf32> -> vector<256x128xf32>
    %10 = vector.shape_cast %0 : vector<16x16x32xbf16> to vector<256x32xbf16>
    %c1 = arith.constant 1 : index
    %c0_6 = arith.constant 0 : index
    %c0_7 = arith.constant 0 : index
    %11 = vector.load %arg2[%c1, %c0_6, %c0_7] : memref<3x32x128xbf16, #tpu.memory_space<vmem>>, vector<1x32x128xbf16>
    %12 = vector.shape_cast %11 : vector<1x32x128xbf16> to vector<32x128xbf16>
    %cst_8 = arith.constant dense<0.000000e+00> : vector<256x128xf32>
    %13 = tpu.matmul %10, %12, %cst_8 {dimension_numbers = #tpu.dot_dimension_numbers<[1], [0], [0], [1], [0, 0, 1, 1], [], []>} : vector<256x32xbf16>, vector<32x128xbf16>, vector<256x128xf32> -> vector<256x128xf32>
    %14 = arith.addf %9, %13 : vector<256x128xf32>
    %15 = vector.shape_cast %5 : vector<16x16x32xbf16> to vector<256x32xbf16>
    %c2 = arith.constant 2 : index
    %c0_9 = arith.constant 0 : index
    %c0_10 = arith.constant 0 : index
    %16 = vector.load %arg2[%c2, %c0_9, %c0_10] : memref<3x32x128xbf16, #tpu.memory_space<vmem>>, vector<1x32x128xbf16>
    %17 = vector.shape_cast %16 : vector<1x32x128xbf16> to vector<32x128xbf16>
    %cst_11 = arith.constant dense<0.000000e+00> : vector<256x128xf32>
    %18 = tpu.matmul %15, %17, %cst_11 {dimension_numbers = #tpu.dot_dimension_numbers<[1], [0], [0], [1], [0, 0, 1, 1], [], []>} : vector<256x32xbf16>, vector<32x128xbf16>, vector<256x128xf32> -> vector<256x128xf32>
    %19 = arith.addf %14, %18 : vector<256x128xf32>
    %c0_12 = arith.constant 0 : index
    %c0_13 = arith.constant 0 : index
    %20 = vector.load %arg3[%c0_12, %c0_13] : memref<1x128xf32, #tpu.memory_space<vmem>>, vector<1x128xf32>
    %21 = vector.broadcast %20 : vector<1x128xf32> to vector<256x128xf32>
    %22 = arith.addf %19, %21 : vector<256x128xf32>
    %cst_14 = arith.constant 0.000000e+00 : f32
    %23 = vector.broadcast %cst_14 : f32 to vector<256x128xf32>
    %24 = arith.maximumf %22, %23 : vector<256x128xf32>
    %25 = arith.truncf %24 : vector<256x128xf32> to vector<256x128xbf16>
    %26 = vector.shape_cast %25 : vector<256x128xbf16> to vector<16x16x128xbf16>
    %27 = vector.shape_cast %26 : vector<16x16x128xbf16> to vector<8x2x16x128xbf16>
    %28 = vector.extract_strided_slice %27 {offsets = [0, 0, 0, 0], sizes = [8, 1, 16, 128], strides = [1, 1, 1, 1]} : vector<8x2x16x128xbf16> to vector<8x1x16x128xbf16>
    %29 = vector.shape_cast %28 : vector<8x1x16x128xbf16> to vector<8x16x128xbf16>
    %30 = vector.extract_strided_slice %27 {offsets = [0, 1, 0, 0], sizes = [8, 1, 16, 128], strides = [1, 1, 1, 1]} : vector<8x2x16x128xbf16> to vector<8x1x16x128xbf16>
    %31 = vector.shape_cast %30 : vector<8x1x16x128xbf16> to vector<8x16x128xbf16>
    %32 = arith.maximumf %29, %31 : vector<8x16x128xbf16>
    %cst_15 = arith.constant 0.000000e+00 : bf16
    %33 = vector.broadcast %cst_15 : bf16 to vector<1x16x128xbf16>
    %34 = vector.extract_strided_slice %32 {offsets = [0, 0, 0], sizes = [7, 16, 128], strides = [1, 1, 1]} : vector<8x16x128xbf16> to vector<7x16x128xbf16>
    %35 = tpu.concatenate %33, %34 in 0 : vector<1x16x128xbf16>, vector<7x16x128xbf16> -> vector<8x16x128xbf16>
    %36 = vector.extract_strided_slice %32 {offsets = [1, 0, 0], sizes = [7, 16, 128], strides = [1, 1, 1]} : vector<8x16x128xbf16> to vector<7x16x128xbf16>
    %37 = tpu.concatenate %36, %33 in 0 : vector<7x16x128xbf16>, vector<1x16x128xbf16> -> vector<8x16x128xbf16>
    %38 = vector.shape_cast %35 : vector<8x16x128xbf16> to vector<128x128xbf16>
    %c0_16 = arith.constant 0 : index
    %c0_17 = arith.constant 0 : index
    %c0_18 = arith.constant 0 : index
    %39 = vector.load %arg4[%c0_16, %c0_17, %c0_18] : memref<3x128x64xbf16, #tpu.memory_space<vmem>>, vector<1x128x64xbf16>
    %40 = vector.shape_cast %39 : vector<1x128x64xbf16> to vector<128x64xbf16>
    %cst_19 = arith.constant dense<0.000000e+00> : vector<128x64xf32>
    %41 = tpu.matmul %38, %40, %cst_19 {dimension_numbers = #tpu.dot_dimension_numbers<[1], [0], [0], [1], [0, 0, 1, 1], [], []>} : vector<128x128xbf16>, vector<128x64xbf16>, vector<128x64xf32> -> vector<128x64xf32>
    %42 = vector.shape_cast %32 : vector<8x16x128xbf16> to vector<128x128xbf16>
    %c1_20 = arith.constant 1 : index
    %c0_21 = arith.constant 0 : index
    %c0_22 = arith.constant 0 : index
    %43 = vector.load %arg4[%c1_20, %c0_21, %c0_22] : memref<3x128x64xbf16, #tpu.memory_space<vmem>>, vector<1x128x64xbf16>
    %44 = vector.shape_cast %43 : vector<1x128x64xbf16> to vector<128x64xbf16>
    %cst_23 = arith.constant dense<0.000000e+00> : vector<128x64xf32>
    %45 = tpu.matmul %42, %44, %cst_23 {dimension_numbers = #tpu.dot_dimension_numbers<[1], [0], [0], [1], [0, 0, 1, 1], [], []>} : vector<128x128xbf16>, vector<128x64xbf16>, vector<128x64xf32> -> vector<128x64xf32>
    %46 = arith.addf %41, %45 : vector<128x64xf32>
    %47 = vector.shape_cast %37 : vector<8x16x128xbf16> to vector<128x128xbf16>
    %c2_24 = arith.constant 2 : index
    %c0_25 = arith.constant 0 : index
    %c0_26 = arith.constant 0 : index
    %48 = vector.load %arg4[%c2_24, %c0_25, %c0_26] : memref<3x128x64xbf16, #tpu.memory_space<vmem>>, vector<1x128x64xbf16>
    %49 = vector.shape_cast %48 : vector<1x128x64xbf16> to vector<128x64xbf16>
    %cst_27 = arith.constant dense<0.000000e+00> : vector<128x64xf32>
    %50 = tpu.matmul %47, %49, %cst_27 {dimension_numbers = #tpu.dot_dimension_numbers<[1], [0], [0], [1], [0, 0, 1, 1], [], []>} : vector<128x128xbf16>, vector<128x64xbf16>, vector<128x64xf32> -> vector<128x64xf32>
    %51 = arith.addf %46, %50 : vector<128x64xf32>
    %c0_28 = arith.constant 0 : index
    %c0_29 = arith.constant 0 : index
    %52 = vector.load %arg5[%c0_28, %c0_29] : memref<1x64xf32, #tpu.memory_space<vmem>>, vector<1x64xf32>
    %53 = vector.broadcast %52 : vector<1x64xf32> to vector<128x64xf32>
    %54 = arith.addf %51, %53 : vector<128x64xf32>
    %cst_30 = arith.constant 0.000000e+00 : f32
    %55 = vector.broadcast %cst_30 : f32 to vector<128x64xf32>
    %56 = arith.maximumf %54, %55 : vector<128x64xf32>
    %57 = arith.truncf %56 : vector<128x64xf32> to vector<128x64xbf16>
    %58 = vector.shape_cast %57 : vector<128x64xbf16> to vector<8x16x64xbf16>
    %59 = vector.shape_cast %58 : vector<8x16x64xbf16> to vector<4x2x16x64xbf16>
    %60 = vector.extract_strided_slice %59 {offsets = [0, 0, 0, 0], sizes = [4, 1, 16, 64], strides = [1, 1, 1, 1]} : vector<4x2x16x64xbf16> to vector<4x1x16x64xbf16>
    %61 = vector.shape_cast %60 : vector<4x1x16x64xbf16> to vector<4x16x64xbf16>
    %62 = vector.extract_strided_slice %59 {offsets = [0, 1, 0, 0], sizes = [4, 1, 16, 64], strides = [1, 1, 1, 1]} : vector<4x2x16x64xbf16> to vector<4x1x16x64xbf16>
    %63 = vector.shape_cast %62 : vector<4x1x16x64xbf16> to vector<4x16x64xbf16>
    %64 = arith.maximumf %61, %63 : vector<4x16x64xbf16>
    %c0_31 = arith.constant 0 : index
    %c0_32 = arith.constant 0 : index
    %c0_33 = arith.constant 0 : index
    %65 = vector.load %arg9[%c0_31, %c0_32, %c0_33] : memref<4x16x64xbf16, #tpu.memory_space<vmem>>, vector<4x16x64xbf16>
    tpu.vector_store %arg9[%c0_31, %c0_32, %c0_33], %64 {strides = array<i32>} : memref<4x16x64xbf16, #tpu.memory_space<vmem>>, vector<4x16x64xbf16>,
    %cst_34 = arith.constant 0.000000e+00 : f32
    %66 = vector.broadcast %cst_34 : f32 to vector<16x128xf32>
    %c0_i32 = arith.constant 0 : i32
    %c4_i32 = arith.constant 4 : i32
    %67 = arith.addi %c0_i32, %c4_i32 : i32
    %c1_i32 = arith.constant 1 : i32
    %68 = scf.for %arg10 = %c0_i32 to %67 step %c1_i32 iter_args(%arg11 = %66) -> (vector<16x128xf32>)  : i32 {
      %73 = arith.index_cast %arg10 : i32 to index
      %c0_40 = arith.constant 0 : index
      %c0_41 = arith.constant 0 : index
      %74 = vector.load %arg9[%73, %c0_40, %c0_41] : memref<4x16x64xbf16, #tpu.memory_space<vmem>>, vector<1x16x64xbf16>
      %75 = vector.shape_cast %74 : vector<1x16x64xbf16> to vector<16x64xbf16>
      %76 = arith.index_cast %arg10 : i32 to index
      %c0_42 = arith.constant 0 : index
      %c0_43 = arith.constant 0 : index
      %77 = vector.load %arg6[%76, %c0_42, %c0_43] : memref<4x64x128xbf16, #tpu.memory_space<vmem>>, vector<1x64x128xbf16>
      %78 = vector.shape_cast %77 : vector<1x64x128xbf16> to vector<64x128xbf16>
      %cst_44 = arith.constant dense<0.000000e+00> : vector<16x128xf32>
      %79 = tpu.matmul %75, %78, %cst_44 {dimension_numbers = #tpu.dot_dimension_numbers<[1], [0], [0], [1], [0, 0, 1, 1], [], []>} : vector<16x64xbf16>, vector<64x128xbf16>, vector<16x128xf32> -> vector<16x128xf32>
      %80 = arith.addf %arg11, %79 : vector<16x128xf32>
      scf.yield %80 : vector<16x128xf32>
    }
    %c4_i32_35 = arith.constant 4 : i32
    %c0_36 = arith.constant 0 : index
    %c0_37 = arith.constant 0 : index
    %69 = vector.load %arg7[%c0_36, %c0_37] : memref<1x128xf32, #tpu.memory_space<vmem>>, vector<1x128xf32>
    %70 = vector.broadcast %69 : vector<1x128xf32> to vector<16x128xf32>
    %71 = arith.addf %68, %70 : vector<16x128xf32>
    %c0_38 = arith.constant 0 : index
    %c0_39 = arith.constant 0 : index
    %72 = vector.load %arg8[%c0_38, %c0_39] : memref<16x128xf32, #tpu.memory_space<vmem>>, vector<16x128xf32>
    tpu.vector_store %arg8[%c0_38, %c0_39], %71 {strides = array<i32>} : memref<16x128xf32, #tpu.memory_space<vmem>>, vector<16x128xf32>,
    return
  }
  func.func @transform_0(%arg0: i32) -> (i32, i32, i32) {
    %c0_i32 = arith.constant 0 : i32
    %c0_i32_0 = arith.constant 0 : i32
    %c0_i32_1 = arith.constant 0 : i32
    return %c0_i32, %arg0, %c0_i32_0 : i32, i32, i32
  }
  func.func @transform_1(%arg0: i32) -> (i32, i32, i32) {
    %c0_i32 = arith.constant 0 : i32
    %c0_i32_0 = arith.constant 0 : i32
    %c0_i32_1 = arith.constant 0 : i32
    %c0_i32_2 = arith.constant 0 : i32
    return %c0_i32, %c0_i32_0, %c0_i32_1 : i32, i32, i32
  }
  func.func @transform_2(%arg0: i32) -> (i32, i32) {
    %c0_i32 = arith.constant 0 : i32
    %c0_i32_0 = arith.constant 0 : i32
    %c0_i32_1 = arith.constant 0 : i32
    return %c0_i32, %c0_i32_0 : i32, i32
  }
  func.func @transform_3(%arg0: i32) -> (i32, i32, i32) {
    %c0_i32 = arith.constant 0 : i32
    %c0_i32_0 = arith.constant 0 : i32
    %c0_i32_1 = arith.constant 0 : i32
    %c0_i32_2 = arith.constant 0 : i32
    return %c0_i32, %c0_i32_0, %c0_i32_1 : i32, i32, i32
  }
  func.func @transform_4(%arg0: i32) -> (i32, i32) {
    %c0_i32 = arith.constant 0 : i32
    %c0_i32_0 = arith.constant 0 : i32
    %c0_i32_1 = arith.constant 0 : i32
    return %c0_i32, %c0_i32_0 : i32, i32
  }
  func.func @transform_5(%arg0: i32) -> (i32, i32, i32) {
    %c0_i32 = arith.constant 0 : i32
    %c0_i32_0 = arith.constant 0 : i32
    %c0_i32_1 = arith.constant 0 : i32
    %c0_i32_2 = arith.constant 0 : i32
    return %c0_i32, %c0_i32_0, %c0_i32_1 : i32, i32, i32
  }
  func.func @transform_6(%arg0: i32) -> (i32, i32) {
    %c0_i32 = arith.constant 0 : i32
    %c0_i32_0 = arith.constant 0 : i32
    %c0_i32_1 = arith.constant 0 : i32
    return %c0_i32, %c0_i32_0 : i32, i32
  }
  func.func @transform_7(%arg0: i32) -> (i32, i32) {
    %c0_i32 = arith.constant 0 : i32
    %c0_i32_0 = arith.constant 0 : i32
    return %arg0, %c0_i32 : i32, i32
  }
}

</mosaic_0001>

<bundles_post_ra>
// kernel: tpu_custom_call.1
= control target key start
LH: loop header
LB: loop body
LE: loop exit
PB: predicated region body
PF: predicated region fallthrough
CT: control target
= control target key end

     0   :  { %12 = vsyncpa [#allocation4], 0  ;;  %s2728_s0 = inlined_call_operand.vmem [shape: bf16[16,16,32], index: 0, kind: input, shape index: {}]   ;;  %s2729_s1 = inlined_call_operand.hbm [shape: bf16[3,32,128], index: 1, kind: input, shape index: {}]   ;;  %s2730_s2 = inlined_call_operand.vmem [shape: f32[1,128], index: 2, kind: input, shape index: {}]   ;;  %s2731_s3 = inlined_call_operand.vmem [shape: bf16[3,128,64], index: 3, kind: input, shape index: {}]   ;;  %s2732_s4 = inlined_call_operand.vmem [shape: f32[1,64], index: 4, kind: input, shape index: {}]   ;;  %s2733_s5 = inlined_call_operand.vmem [shape: bf16[4,64,128], index: 5, kind: input, shape index: {}]   ;;  %s2734_s6 = inlined_call_operand.vmem [shape: f32[1,128], index: 6, kind: input, shape index: {}]   ;;  %s2735_s7 = inlined_call_operand.hbm [shape: f32[16,128], index: 7, kind: output, shape index: {}]  }
   0x1   :  { %13 = vsyncpa [#allocation5], 0  ;;  %s2232_s24 = smov [#allocation3]  }
   0x2   :  { %s21_s25 = sshll.u32 %s2232_s24, 4  ;;  %s22_s25 = int_to_ptr.vmem [resolvable:$true] %s21_s25 }
   0x3   :  { %s2172_s26 = scalar_lea.vmem %s22_s25, 768  ;;  %p2177_p1 = scmp.lt.s32.totalorder %s22_s25, %s22_s25 }
   0x4   :  { %p2173_p0 = scmp.ne.s32.totalorder %s22_s25, %s2172_s26  ;;  %p2178_p2 = scmp.lt.s32.totalorder %s2172_s26, %s2172_s26 }
   0x6   :  { %p2179_p3 = por %p2178_p2, %p2177_p1 }
   0x8   :  { %p2180_p4 = pnand %p2179_p3, %p2173_p0 }
   0xa   :  { %2183 = shalt.err (!%p2180_p4)
}
   0xb   :  { %s2233_s27 = smov 64   ;;  %s2234_s28 = smov 4  }
   0xc   :  { %27 = dma.hbm_to_vmem [thread:$0]  %s2729_s1, 768, %s22_s25, [#allocation4], %s2233_s27, %s2233_s27, %s2234_s28  }
   0xd   :  { %2216 = dma.done.wait [#allocation4], 768  }
   0xe   :  { %2217 = vsyncadd [#allocation4], 4294966528  ;;  %v2113_v0 = vld [vmem:[#allocation3 + $0x18] sm:$0xff]   ;;  %v2114_v1 = vld [vmem:[#allocation3 + $0x10] sm:$0xff]   ;;  %vm175_vm0 = vcmask 261120   ;;  %v2736_v15 = vmov 0  }
   0xf   :  { %1860 = vmatprep.subr.bf16.mxu0 %v2113_v0  ;;  %2076 = vmatprep.subr.bf16.mxu1 %v2113_v0  ;;  %v2115_v2 = vld [vmem:[%s2728_s0] sm:$0xff]   ;;  %v2117_v4 = vld [vmem:[%s2728_s0 + $0x8] sm:$0xff]   ;;  %v2120_v7 = vld [vmem:[%s2728_s0 + $0x10] sm:$0xff]   ;;  %v1655_v24 = vcombine.low %v2736_v15, %v2736_v15  ;;  %vm1452_vm1 = vcmask 519168  }
  0x10   :  { %1861 = vmatpush3.bf16.msra.mxu0 %v2113_v0  ;;  %2078 = vmatpush3.bf16.msra.mxu1 %v2113_v0  ;;  %v2290_v3 = vld [vmem:[%s2728_s0 + $0x60] sm:$0xff]   ;;  %v2301_v5 = vld [vmem:[%s2728_s0 + $0x68] sm:$0xff]   ;;  %v2309_v8 = vld [vmem:[%s2728_s0 + $0x70] sm:$0xff]  }
  0x11   :  { %1862 = vmatprep.subr.bf16.mxu0 %v2114_v1  ;;  %2077 = vmatprep.subr.bf16.mxu1 %v2114_v1  ;;  %v2119_v6 = vld [vmem:[#allocation3 + $0x28] sm:$0xff]   ;;  %v2125_v10 = vld [vmem:[#allocation3] sm:$0xff]   ;;  %v2122_v11 = vld [vmem:[%s2728_s0 + $0x18] sm:$0xff]  }
  0x12   :  { %1864 = vmatprep.mubr.msk.bf16.mxu0 %vm175_vm0, %v2115_v2  ;;  %1888 = vmatprep.mubr.msk.bf16.mxu1 %vm175_vm0, %v2290_v3  ;;  %v2124_v9 = vld [vmem:[#allocation3 + $0x8] sm:$0xff]   ;;  %v2123_v12 = vld [vmem:[%s2728_s0 + $0x78] sm:$0xff]   ;;  %v2126_v13 = vld [vmem:[%s2728_s0 + $0x20] sm:$0xff]  }
  0x13   :  { %v2130_v14 = vld [vmem:[#allocation3 + $0x20] sm:$0xff]   ;;  %v2127_v16 = vld [vmem:[%s2728_s0 + $0x28] sm:$0xff]   ;;  %v2128_v17 = vld [vmem:[%s2728_s0 + $0x30] sm:$0xff]  }
  0x14   :  { %1863 = vmatpush3.bf16.msra.mxu0 %v2114_v1  ;;  %2079 = vmatpush3.bf16.msra.mxu1 %v2114_v1  ;;  %v2129_v18 = vld [vmem:[%s2728_s0 + $0x38] sm:$0xff]   ;;  %v2131_v19 = vld [vmem:[%s2728_s0 + $0x40] sm:$0xff]   ;;  %v2132_v20 = vld [vmem:[%s2728_s0 + $0x48] sm:$0xff]  }
  0x15   :  { %1932 = vmatprep.subr.bf16.mxu0 %v2119_v6  ;;  %1896 = vmatprep.subr.bf16.mxu1 %v2124_v9  ;;  %v2133_v21 = vld [vmem:[%s2728_s0 + $0x50] sm:$0xff]   ;;  %v2134_v22 = vld [vmem:[%s2728_s0 + $0x58] sm:$0xff]   ;;  %v2137_v26 = vld [vmem:[%s2731_s3 + $0x68] sm:$0xff]  }
  0x16   :  { %v2135_v23 = vld [vmem:[%s2731_s3 + $0x78] sm:$0xff]   ;;  %v2136_v25 = vld [vmem:[%s2731_s3 + $0x70] sm:$0xff]   ;;  %v2139_v28 = vld [vmem:[%s2731_s3 + $0x60] sm:$0xff]  }
  0x17   :  { %1865 = vmatmul.mubr.msk.bf16.vlgmr.msra.gmra.mxu0 %vm175_vm0, %v2117_v4  ;;  %1889 = vmatmul.mubr.msk.bf16.vlgmr.msra.gmra.mxu1 %vm175_vm0, %v2301_v5  ;;  %v2138_v27 = vld [vmem:[%s2731_s3 + $0xb8] sm:$0xff]   ;;  %v2140_v29 = vld [vmem:[%s2731_s3 + $0xb0] sm:$0xff]   ;;  %v2142_v31 = vld [vmem:[%s2731_s3 + $0xa8] sm:$0xff]  }
  0x18   :  { %1933 = vmatpush3.bf16.msra.mxu0 %v2119_v6  ;;  %1868 = vmatprep.mubr.msk.bf16.mxu0 %vm175_vm0, %v2120_v7  ;;  %v2141_v30 = vld [vmem:[%s2731_s3 + $0x58] sm:$0xff]   ;;  %v2143_v32 = vld [vmem:[%s2731_s3 + $0x50] sm:$0xff]   ;;  %v2144_v33 = vld [vmem:[%s2731_s3 + $0xa0] sm:$0xff]  }
  0x19   :  { %1892 = vmatprep.mubr.msk.bf16.mxu1 %vm175_vm0, %v2309_v8  ;;  %1897 = vmatpush3.bf16.msra.mxu1 %v2124_v9  ;;  %v2145_v34 = vld [vmem:[%s2731_s3 + $0x48] sm:$0xff]   ;;  %v2146_v35 = vld [vmem:[%s2731_s3 + $0x98] sm:$0xff]   ;;  %v2147_v36 = vld [vmem:[%s2731_s3 + $0x40] sm:$0xff]  }
  0x1a   :  { %1898 = vmatprep.subr.bf16.mxu1 %v2125_v10  ;;  %1934 = vmatprep.subr.bf16.mxu0 %v2130_v14  ;;  %v2148_v37 = vld [vmem:[%s2731_s3 + $0x90] sm:$0xff]   ;;  %v2149_v38 = vld [vmem:[%s2731_s3 + $0x88] sm:$0xff]   ;;  %v2150_v39 = vld [vmem:[%s2731_s3 + $0x80] sm:$0xff]  }
  0x1b   :  { %v2448_v40 = vld [vmem:[%s2731_s3 + $0x38] sm:$0xff]  }
  0x1c   :  { %1935 = vmatpush3.bf16.msra.mxu0 %v2130_v14 }
  0x1d   :  { %1899 = vmatpush3.bf16.msra.mxu1 %v2125_v10  ;;  %2032 = vmatprep.subr.bf16.mxu0 %v2138_v27 }
  0x1e   :  { %1968 = vmatprep.subr.bf16.mxu1 %v2135_v23 }
  0x1f   :  { %1869 = vmatmul.mubr.msk.bf16.gmra.mxu0 %vm175_vm0, %v2122_v11  ;;  %1893 = vmatmul.mubr.msk.bf16.gmra.mxu1 %vm175_vm0, %v2123_v12 }
  0x20   :  { %1872 = vmatprep.mubr.msk.bf16.mxu0 %vm175_vm0, %v2126_v13  ;;  %1900 = vmatprep.mubr.bf16.mxu1 %v2736_v15 }
  0x27   :  { %1873 = vmatmul.mubr.msk.bf16.gmra.mxu0 %vm175_vm0, %v2127_v16  ;;  %1901 = vmatmul.mubr.msk.bf16.vlgmr.msra.gmra.mxu1 %vm175_vm0, %v2115_v2 }
  0x28   :  { %1876 = vmatprep.mubr.msk.bf16.mxu0 %vm175_vm0, %v2128_v17  ;;  %1904 = vmatprep.mubr.msk.bf16.mxu1 %vm175_vm0, %v2117_v4 }
  0x29   :  { %1969 = vmatpush3.bf16.msra.mxu1 %v2135_v23 }
  0x2a   :  { %1970 = vmatprep.subr.bf16.mxu1 %v2136_v25 }
  0x2d   :  { %1971 = vmatpush3.bf16.msra.mxu1 %v2136_v25 }
  0x2e   :  { %1972 = vmatprep.subr.bf16.mxu1 %v2137_v26 }
  0x2f   :  { %1877 = vmatmul.mubr.msk.bf16.gmra.mxu0 %vm175_vm0, %v2129_v18  ;;  %1905 = vmatmul.mubr.msk.bf16.gmra.mxu1 %vm175_vm0, %v2120_v7 }
  0x30   :  { %1880 = vmatprep.mubr.msk.bf16.mxu0 %vm175_vm0, %v2131_v19  ;;  %1908 = vmatprep.mubr.msk.bf16.mxu1 %vm175_vm0, %v2122_v11 }
  0x31   :  { %1973 = vmatpush3.bf16.msra.mxu1 %v2137_v26 }
  0x32   :  { %1974 = vmatprep.subr.bf16.mxu1 %v2139_v28 }
  0x35   :  { %1975 = vmatpush3.bf16.msra.mxu1 %v2139_v28 }
  0x36   :  { %1976 = vmatprep.subr.bf16.mxu1 %v2141_v30 }
  0x37   :  { %1881 = vmatmul.mubr.msk.bf16.gmra.mxu0 %vm175_vm0, %v2132_v20  ;;  %1909 = vmatmul.mubr.msk.bf16.gmra.mxu1 %vm175_vm0, %v2126_v13 }
  0x38   :  { %1884 = vmatprep.mubr.msk.bf16.mxu0 %vm175_vm0, %v2133_v21  ;;  %1912 = vmatprep.mubr.msk.bf16.mxu1 %vm175_vm0, %v2127_v16 }
  0x39   :  { %1977 = vmatpush3.bf16.msra.mxu1 %v2141_v30 }
  0x3a   :  { %1978 = vmatprep.subr.bf16.mxu1 %v2143_v32 }
  0x3d   :  { %1979 = vmatpush3.bf16.msra.mxu1 %v2143_v32 }
  0x3e   :  { %1980 = vmatprep.subr.bf16.mxu1 %v2145_v34 }
  0x3f   :  { %1885 = vmatmul.mubr.msk.bf16.gmra.mxu0 %vm175_vm0, %v2134_v22  ;;  %1913 = vmatmul.mubr.msk.bf16.gmra.mxu1 %vm175_vm0, %v2128_v17 }
  0x40   :  { %1916 = vmatprep.mubr.msk.bf16.mxu1 %vm175_vm0, %v2129_v18  ;;  %1936 = vmatprep.mubr.msk.bf16.mxu0 %vm175_vm0, %v2117_v4 }
  0x41   :  { %1981 = vmatpush3.bf16.msra.mxu1 %v2145_v34 }
  0x42   :  { %1982 = vmatprep.subr.bf16.mxu1 %v2147_v36 }
  0x45   :  { %1983 = vmatpush3.bf16.msra.mxu1 %v2147_v36 }
  0x46   :  { %2000 = vmatprep.subr.bf16.mxu1 %v2448_v40 }
  0x47   :  { %1917 = vmatmul.mubr.msk.bf16.gmra.mxu1 %vm175_vm0, %v2131_v19  ;;  %1937 = vmatmul.mubr.msk.bf16.vlgmr.msra.gmra.mxu0 %vm175_vm0, %v2120_v7 }
  0x48   :  { %1920 = vmatprep.mubr.msk.bf16.mxu1 %vm175_vm0, %v2132_v20  ;;  %1940 = vmatprep.mubr.msk.bf16.mxu0 %vm175_vm0, %v2122_v11 }
  0x49   :  { %2033 = vmatpush3.bf16.msra.mxu0 %v2138_v27 }
  0x4a   :  { %2034 = vmatprep.subr.bf16.mxu0 %v2140_v29 }
  0x4d   :  { %2035 = vmatpush3.bf16.msra.mxu0 %v2140_v29 }
  0x4e   :  { %2036 = vmatprep.subr.bf16.mxu0 %v2142_v31 }
  0x4f   :  { %1921 = vmatmul.mubr.msk.bf16.gmra.mxu1 %vm175_vm0, %v2133_v21  ;;  %1941 = vmatmul.mubr.msk.bf16.gmra.mxu0 %vm175_vm0, %v2126_v13 }
  0x50   :  { %1924 = vmatprep.mubr.msk.bf16.mxu1 %vm175_vm0, %v2134_v22  ;;  %1944 = vmatprep.mubr.msk.bf16.mxu0 %vm175_vm0, %v2127_v16 }
  0x51   :  { %2037 = vmatpush3.bf16.msra.mxu0 %v2142_v31 }
  0x52   :  { %2038 = vmatprep.subr.bf16.mxu0 %v2144_v33 }
  0x55   :  { %2039 = vmatpush3.bf16.msra.mxu0 %v2144_v33 }
  0x56   :  { %2040 = vmatprep.subr.bf16.mxu0 %v2146_v35 }
  0x57   :  { %1925 = vmatmul.mubr.msk.bf16.gmra.mxu1 %vm175_vm0, %v2290_v3  ;;  %1945 = vmatmul.mubr.msk.bf16.gmra.mxu0 %vm175_vm0, %v2128_v17 }
  0x58   :  { %1928 = vmatprep.mubr.msk.bf16.mxu1 %vm175_vm0, %v2301_v5  ;;  %1948 = vmatprep.mubr.msk.bf16.mxu0 %vm175_vm0, %v2129_v18 }
  0x59   :  { %2041 = vmatpush3.bf16.msra.mxu0 %v2146_v35  ;;  %v2522_v35 = vld [vmem:[%s2730_s2] ss:$0 sm:$0xff] }
  0x5a   :  { %2042 = vmatprep.subr.bf16.mxu0 %v2148_v37 }
  0x5d   :  { %2043 = vmatpush3.bf16.msra.mxu0 %v2148_v37 }
  0x5e   :  { %2044 = vmatprep.subr.bf16.mxu0 %v2149_v38 }
  0x5f   :  { %1929 = vmatmul.mubr.msk.bf16.gmra.mxu1 %vm175_vm0, %v2309_v8  ;;  %1949 = vmatmul.mubr.msk.bf16.gmra.mxu0 %vm175_vm0, %v2131_v19 }
  0x60   :  { %1952 = vmatprep.mubr.msk.bf16.mxu0 %vm175_vm0, %v2132_v20 }
  0x61   :  { %2045 = vmatpush3.bf16.msra.mxu0 %v2149_v38 }
  0x62   :  { %2046 = vmatprep.subr.bf16.mxu0 %v2150_v39 }
  0x65   :  { %2047 = vmatpush3.bf16.msra.mxu0 %v2150_v39 }
  0x67   :  { %1953 = vmatmul.mubr.msk.bf16.gmra.mxu0 %vm175_vm0, %v2133_v21 }
  0x68   :  { %1956 = vmatprep.mubr.msk.bf16.mxu0 %vm175_vm0, %v2134_v22 }
  0x6f   :  { %1957 = vmatmul.mubr.msk.bf16.gmra.mxu0 %vm175_vm0, %v2290_v3 }
  0x70   :  { %1960 = vmatprep.mubr.msk.bf16.mxu0 %vm175_vm0, %v2301_v5 }
  0x77   :  { %1961 = vmatmul.mubr.msk.bf16.gmra.mxu0 %vm175_vm0, %v2309_v8 }
  0x78   :  { %1964 = vmatprep.mubr.msk.bf16.mxu0 %vm175_vm0, %v2123_v12 }
  0x7f   :  { %1965 = vmatmul.mubr.msk.bf16.gmra.mxu0 %vm175_vm0, %v1655_v24 }
  0xd7   :  { %v1866_v41 = vpop.f32.mrf.mxu0  ;;  %v2451_v42 = vpop.f32.mrf.mxu1 }
  0xd9   :  { %v258_v43 = vpop.f32.mrf.mxu0  ;;  %v2453_v44 = vpop.f32.mrf.mxu1 }
  0xdb   :  { %v1867_v45 = vpop.f32.mrf.mxu0  ;;  %v2455_v46 = vpop.f32.mrf.mxu1 }
  0xdd   :  { %v261_v47 = vpop.f32.mrf.mxu0  ;;  %v2457_v48 = vpop.f32.mrf.mxu1 }
  0xdf   :  { %v1870_v49 = vpop.f32.mrf.mxu0  ;;  %v2459_v50 = vpop.f32.mrf.mxu1 }
  0xe1   :  { %v274_v51 = vpop.f32.mrf.mxu0  ;;  %v2461_v52 = vpop.f32.mrf.mxu1 }
  0xe3   :  { %v2463_v53 = vpop.f32.mrf.mxu0  ;;  %v2465_v54 = vpop.f32.mrf.mxu1 }
  0xe4   :  { %2738 = vst [vmem:[#allocation9_spill] sm:$0xff] %v2465_v54 }
  0xe5   :  { %v2467_v55 = vpop.f32.mrf.mxu0  ;;  %v2469_v56 = vpop.f32.mrf.mxu1 }
  0xe6   :  { %2739 = vst [vmem:[#allocation10_spill] sm:$0xff] %v2469_v56 }
  0xe7   :  { %v2471_v57 = vpop.f32.mrf.mxu0  ;;  %v1902_v58 = vpop.f32.mrf.mxu1 }
  0xe8   :  { %v443_v28 = vadd.f32 %v1902_v58, %v1866_v41 }
  0xe9   :  { %v2473_v59 = vpop.f32.mrf.mxu0  ;;  %v434_v60 = vpop.f32.mrf.mxu1 }
  0xea   :  { %v435_v29 = vadd.f32 %v434_v60, %v258_v43 }
  0xeb   :  { %v2475_v61 = vpop.f32.mrf.mxu0  ;;  %v1903_v62 = vpop.f32.mrf.mxu1 }
  0xec   :  { %v446_v32 = vadd.f32 %v1903_v62, %v1867_v45 }
  0xed   :  { %v2477_v63 = vpop.f32.mrf.mxu0  ;;  %v437_v0 = vpop.f32.mrf.mxu1 }
  0xee   :  { %v438_v37 = vadd.f32 %v437_v0, %v261_v47 }
  0xef   :  { %v2479_v1 = vpop.f32.mrf.mxu0  ;;  %v1906_v2 = vpop.f32.mrf.mxu1 }
  0xf0   :  { %v459_v60 = vadd.f32 %v1906_v2, %v1870_v49 }
  0xf1   :  { %v2481_v3 = vpop.f32.mrf.mxu0  ;;  %v450_v4 = vpop.f32.mrf.mxu1 }
  0xf3   :  { %v2483_v5 = vpop.f32.mrf.mxu0  ;;  %v1907_v6 = vpop.f32.mrf.mxu1 }
  0xf5   :  { %v2485_v7 = vpop.f32.mrf.mxu0  ;;  %v453_v8 = vpop.f32.mrf.mxu1 }
  0xf7   :  { %v2487_v9 = vpop.f32.mrf.mxu0  ;;  %v1910_v10 = vpop.f32.mrf.mxu1 }
  0xf9   :  { %v2489_v11 = vpop.f32.mrf.mxu0  ;;  %v466_v12 = vpop.f32.mrf.mxu1 }
  0xfb   :  { %v2491_v13 = vpop.f32.mrf.mxu0  ;;  %v2493_v14 = vpop.f32.mrf.mxu1 }
  0xfd   :  { %v2495_v16 = vpop.f32.mrf.mxu0  ;;  %v2497_v17 = vpop.f32.mrf.mxu1 }
  0xff   :  { %v2499_v18 = vpop.f32.mrf.mxu0  ;;  %v2501_v19 = vpop.f32.mrf.mxu1 }
 0x101   :  { %v2503_v20 = vpop.f32.mrf.mxu0  ;;  %v2505_v21 = vpop.f32.mrf.mxu1 }
 0x103   :  { %v2507_v22 = vpop.f32.mrf.mxu0  ;;  %v2509_v23 = vpop.f32.mrf.mxu1 }
 0x105   :  { %v2511_v24 = vpop.f32.mrf.mxu0  ;;  %v2513_v25 = vpop.f32.mrf.mxu1 }
 0x107   :  { %v2515_v26 = vpop.f32.mrf.mxu1  ;;  %v1938_v27 = vpop.f32.mrf.mxu0 }
 0x108   :  { %v747_v33 = vadd.f32 %v1938_v27, %v443_v28 }
 0x109   :  { %v2517_v30 = vpop.f32.mrf.mxu1  ;;  %v618_v31 = vpop.f32.mrf.mxu0 }
 0x10a   :  { %v745_v34 = vadd.f32 %v618_v31, %v435_v29  ;;  %v786_v41 = vadd.f32 %v2522_v35, %v747_v33  ;;  %v451_v29 = vadd.f32 %v450_v4, %v274_v51 }
 0x10b   :  { %v1939_v36 = vpop.f32.mrf.mxu0  ;;  %v2524_v39 = vpop.f32.mrf.mxu1 }
 0x10c   :  { %v748_v38 = vadd.f32 %v1939_v36, %v446_v32  ;;  %v784_v43 = vadd.f32 %v2522_v35, %v745_v34  ;;  %v462_v32 = vadd.f32 %v1907_v6, %v2463_v53  ;;  %v818_v36 = vmax.f32 %v786_v41, 0.0 }
 0x10d   :  { %v621_v15 = vpop.f32.mrf.mxu0  ;;  %v2530_v31 = vpop.f32.mrf.mxu1  ;;  %v475_v41 = vadd.f32 %v1910_v10, %v2471_v57  ;;  %v470_v10 = vadd.f32 %v2497_v17, %v2477_v63  ;;  %v491_v63 = vadd.f32 %v2501_v19, %v2479_v1  ;;  %v494_v1 = vadd.f32 %v2509_v23, %v2483_v5 }
 0x10e   :  { %v787_v58 = vadd.f32 %v2522_v35, %v748_v38  ;;  %v746_v45 = vadd.f32 %v621_v15, %v438_v37  ;;  %v816_v56 = vmax.f32 %v784_v43, 0.0  ;;  %v454_v38 = vadd.f32 %v453_v8, %v2467_v55 }
 0x10f   :  { %v1942_v62 = vpop.f32.mrf.mxu0  ;;  %v2534_v37 = vpop.f32.mrf.mxu1 }
 0x110   :  { %v819_v27 = vmax.f32 %v787_v58, 0.0  ;;  %v785_v28 = vadd.f32 %v2522_v35, %v746_v45  ;;  %v751_v47 = vadd.f32 %v1942_v62, %v459_v60 }
 0x111   :  { %v634_v0 = vpop.f32.mrf.mxu0  ;;  %v2545_v8 = vpop.f32.mrf.mxu1 }
 0x112   :  { %v817_v33 = vmax.f32 %v785_v28, 0.0  ;;  %v749_v54 = vadd.f32 %v634_v0, %v451_v29  ;;  %v849_v15 = vpack.c.bf16 %v819_v27, %v818_v36  ;;  %v790_v51 = vadd.f32 %v2522_v35, %v751_v47 }
 0x113   :  { %v1943_v34 = vpop.f32.mrf.mxu0 }
 0x114   :  { %v848_v49 = vpack.c.bf16 %v817_v33, %v816_v56  ;;  %v752_v2 = vadd.f32 %v1943_v34, %v462_v32  ;;  %v788_v58 = vadd.f32 %v2522_v35, %v749_v54  ;;  %v467_v56 = vadd.f32 %v466_v12, %v2473_v59  ;;  %v2551_v34 = vpop.f32.mrf.mxu1 }
 0x115   :  { %v637_v4 = vpop.f32.mrf.mxu0  ;;  %v478_v54 = vadd.f32 %v2493_v14, %v2475_v61  ;;  %v822_v28 = vmax.f32 %v790_v51, 0.0 }
 0x116   :  { %v791_v45 = vadd.f32 %v2522_v35, %v752_v2  ;;  %v750_v53 = vadd.f32 %v637_v4, %v454_v38  ;;  %v2539_v6 = vmax.bf16 %v849_v15, %v848_v49  ;;  %v820_v29 = vmax.f32 %v788_v58, 0.0  ;;  %v2152_v49 = vld [vmem:[%s2731_s3 + $0x30] sm:$0xff]   ;;  %v2568_v58 = vpop.f32.mrf.mxu1 }
 0x117   :  { %v1946_v43 = vpop.f32.mrf.mxu0  ;;  %v483_v4 = vadd.f32 %v2505_v21, %v2481_v3  ;;  %v486_v3 = vadd.f32 %v2513_v25, %v2485_v7  ;;  %v2154_v7 = vld [vmem:[%s2731_s3 + $0x20] sm:$0xff]   ;;  %v507_v25 = vadd.f32 %v2515_v26, %v2487_v9 }
 0x118   :  { %v823_v60 = vmax.f32 %v791_v45, 0.0  ;;  %v789_v55 = vadd.f32 %v2522_v35, %v750_v53  ;;  %1984 = vmatprep.mubr.bf16.mxu1 %v2539_v6  ;;  %v755_v62 = vadd.f32 %v1946_v43, %v475_v41 }
 0x119   :  { %v650_v27 = vpop.f32.mrf.mxu0 }
 0x11a   :  { %v821_v47 = vmax.f32 %v789_v55, 0.0  ;;  %v753_v0 = vadd.f32 %v650_v27, %v467_v56  ;;  %v851_v32 = vpack.c.bf16 %v823_v60, %v822_v28  ;;  %v794_v59 = vadd.f32 %v2522_v35, %v755_v62  ;;  %v2153_v60 = vld [vmem:[%s2731_s3 + $0x28] sm:$0xff]  }
 0x11b   :  { %v1947_v57 = vpop.f32.mrf.mxu0 }
 0x11c   :  { %v850_v36 = vpack.c.bf16 %v821_v47, %v820_v29  ;;  %v756_v33 = vadd.f32 %v1947_v57, %v478_v54  ;;  %v792_v61 = vadd.f32 %v2522_v35, %v753_v0  ;;  %v826_v19 = vmax.f32 %v794_v59, 0.0 }
 0x11d   :  { %v653_v12 = vpop.f32.mrf.mxu0  ;;  %v499_v57 = vadd.f32 %v2517_v30, %v2489_v11  ;;  %v2155_v11 = vld [vmem:[%s2731_s3 + $0x18] sm:$0xff]  }
 0x11e   :  { %v2554_v38 = vmax.bf16 %v851_v32, %v850_v36  ;;  %v795_v14 = vadd.f32 %v2522_v35, %v756_v33  ;;  %v754_v15 = vadd.f32 %v653_v12, %v470_v10  ;;  %v824_v41 = vmax.f32 %v792_v61, 0.0 }
 0x11f   :  { %v1950_v17 = vpop.f32.mrf.mxu0  ;;  %v510_v36 = vadd.f32 %v2524_v39, %v2491_v13 }
 0x120   :  { %v827_v2 = vmax.f32 %v795_v14, 0.0  ;;  %v793_v51 = vadd.f32 %v2522_v35, %v754_v15  ;;  %1985 = vmatmul.mubr.bf16.vlgmr.msra.gmra.mxu1 %v2554_v38  ;;  %2048 = vmatprep.mubr.bf16.mxu0 %v2554_v38  ;;  %v759_v45 = vadd.f32 %v1950_v17, %v491_v63  ;;  %v502_v15 = vadd.f32 %v2530_v31, %v2495_v16  ;;  %v2156_v16 = vld [vmem:[%s2731_s3 + $0x10] sm:$0xff]  }
 0x121   :  { %v666_v53 = vpop.f32.mrf.mxu0  ;;  %2001 = vmatpush3.bf16.msra.mxu1 %v2448_v40  ;;  %v2578_v40 = vpop.f32.mrf.mxu1  ;;  %v523_v31 = vadd.f32 %v2534_v37, %v2499_v18 }
 0x122   :  { %v825_v43 = vmax.f32 %v793_v51, 0.0  ;;  %2002 = vmatprep.subr.bf16.mxu1 %v2152_v49  ;;  %v757_v55 = vadd.f32 %v666_v53, %v483_v4  ;;  %v853_v21 = vpack.c.bf16 %v827_v2, %v826_v19  ;;  %v798_v5 = vadd.f32 %v2522_v35, %v759_v45 }
 0x123   :  { %v1951_v56 = vpop.f32.mrf.mxu0  ;;  %v530_v33 = vpop.f32.mrf.mxu1  ;;  %v515_v19 = vadd.f32 %v2545_v8, %v2503_v20  ;;  %v2157_v20 = vld [vmem:[%s2731_s3 + $0x8] sm:$0xff]  }
 0x124   :  { %v852_v62 = vpack.c.bf16 %v825_v43, %v824_v41  ;;  %v760_v27 = vadd.f32 %v1951_v56, %v494_v1  ;;  %v796_v54 = vadd.f32 %v2522_v35, %v757_v55  ;;  %v830_v61 = vmax.f32 %v798_v5, 0.0 }
 0x125   :  { %v669_v23 = vpop.f32.mrf.mxu0  ;;  %2003 = vmatpush3.bf16.msra.mxu1 %v2152_v49  ;;  %v1927_v39 = vpop.f32.mrf.mxu1 }
 0x126   :  { %v799_v28 = vadd.f32 %v2522_v35, %v760_v27  ;;  %v758_v29 = vadd.f32 %v669_v23, %v486_v3  ;;  %v2583_v47 = vmax.bf16 %v853_v21, %v852_v62  ;;  %2004 = vmatprep.subr.bf16.mxu1 %v2153_v60  ;;  %v828_v9 = vmax.f32 %v796_v54, 0.0 }
 0x127   :  { %v1954_v0 = vpop.f32.mrf.mxu0  ;;  %v533_v55 = vpop.f32.mrf.mxu1  ;;  %v518_v27 = vadd.f32 %v2568_v58, %v2511_v24  ;;  %v2158_v24 = vld [vmem:[%s2731_s3] sm:$0xff]  }
 0x128   :  { %v831_v10 = vmax.f32 %v799_v28, 0.0  ;;  %v797_v32 = vadd.f32 %v2522_v35, %v758_v29  ;;  %1988 = vmatprep.mubr.bf16.mxu1 %v2583_v47  ;;  %2049 = vmatmul.mubr.bf16.vlgmr.msra.gmra.mxu0 %v2583_v47  ;;  %v763_v59 = vadd.f32 %v1954_v0, %v507_v25 }
 0x129   :  { %v682_v12 = vpop.f32.mrf.mxu0  ;;  %2005 = vmatpush3.bf16.msra.mxu1 %v2153_v60  ;;  %v526_v60 = vadd.f32 %v2551_v34, %v2507_v22  ;;  %v539_v34 = vadd.f32 %v2578_v40, %v2451_v42  ;;  %v1930_v54 = vpop.f32.mrf.mxu1  ;;  %v531_v42 = vadd.f32 %v530_v33, %v2453_v44  ;;  %v534_v44 = vadd.f32 %v533_v55, %v2457_v48 }
 0x12a   :  { %v829_v26 = vmax.f32 %v797_v32, 0.0  ;;  %v761_v14 = vadd.f32 %v682_v12, %v499_v57  ;;  %2006 = vmatprep.subr.bf16.mxu1 %v2154_v7  ;;  %v855_v49 = vpack.c.bf16 %v831_v10, %v830_v61  ;;  %v802_v17 = vadd.f32 %v2522_v35, %v763_v59 }
 0x12b   :  { %v1955_v30 = vpop.f32.mrf.mxu0  ;;  %v546_v59 = vpop.f32.mrf.mxu1 }
 0x12c   :  { %v854_v63 = vpack.c.bf16 %v829_v26, %v828_v9  ;;  %v764_v13 = vadd.f32 %v1955_v30, %v510_v36  ;;  %v800_v51 = vadd.f32 %v2522_v35, %v761_v14  ;;  %v834_v21 = vmax.f32 %v802_v17, 0.0 }
 0x12d   :  { %v685_v2 = vpop.f32.mrf.mxu0  ;;  %2007 = vmatpush3.bf16.msra.mxu1 %v2154_v7  ;;  %v542_v36 = vadd.f32 %v1927_v39, %v2455_v46 }
 0x12e   :  { %v803_v4 = vadd.f32 %v2522_v35, %v764_v13  ;;  %v762_v45 = vadd.f32 %v685_v2, %v502_v15  ;;  %v2605_v53 = vmax.bf16 %v855_v49, %v854_v63  ;;  %2008 = vmatprep.subr.bf16.mxu1 %v2155_v11  ;;  %v832_v18 = vmax.f32 %v800_v51, 0.0  ;;  %v1931_v13 = vpop.f32.mrf.mxu1 }
 0x12f   :  { %v1958_v1 = vpop.f32.mrf.mxu0  ;;  %v555_v63 = vadd.f32 %v1930_v54, %v2459_v50  ;;  %v2740_v50 = vld [vmem:[#allocation9_spill] sm:$0xff] }
 0x130   :  { %v835_v41 = vmax.f32 %v803_v4, 0.0  ;;  %v801_v43 = vadd.f32 %v2522_v35, %v762_v45  ;;  %1989 = vmatmul.mubr.bf16.gmra.mxu1 %v2605_v53  ;;  %2052 = vmatprep.mubr.bf16.mxu0 %v2605_v53  ;;  %v767_v56 = vadd.f32 %v1958_v1, %v523_v31  ;;  %v547_v4 = vadd.f32 %v546_v59, %v2461_v52 }
 0x131   :  { %v698_v3 = vpop.f32.mrf.mxu0  ;;  %2009 = vmatpush3.bf16.msra.mxu1 %v2155_v11 }
 0x132   :  { %v833_v37 = vmax.f32 %v801_v43, 0.0  ;;  %v765_v62 = vadd.f32 %v698_v3, %v515_v19  ;;  %2010 = vmatprep.subr.bf16.mxu1 %v2156_v16  ;;  %v857_v5 = vpack.c.bf16 %v835_v41, %v834_v21  ;;  %v806_v28 = vadd.f32 %v2522_v35, %v767_v56  ;;  %v549_v41 = vpop.f32.mrf.mxu1 }
 0x133   :  { %v1959_v8 = vpop.f32.mrf.mxu0  ;;  %v558_v19 = vadd.f32 %v1931_v13, %v2740_v50 }
 0x134   :  { %v856_v23 = vpack.c.bf16 %v833_v37, %v832_v18  ;;  %v768_v22 = vadd.f32 %v1959_v8, %v526_v60  ;;  %v804_v7 = vadd.f32 %v2522_v35, %v765_v62  ;;  %v838_v61 = vmax.f32 %v806_v28, 0.0  ;;  %v2741_v18 = vld [vmem:[#allocation10_spill] sm:$0xff] }
 0x135   :  { %v701_v29 = vpop.f32.mrf.mxu0  ;;  %2011 = vmatpush3.bf16.msra.mxu1 %v2156_v16  ;;  %v550_v37 = vadd.f32 %v549_v41, %v2741_v18 }
 0x136   :  { %v807_v25 = vadd.f32 %v2522_v35, %v768_v22  ;;  %v766_v0 = vadd.f32 %v701_v29, %v518_v27  ;;  %v2629_v57 = vmax.bf16 %v857_v5, %v856_v23  ;;  %2012 = vmatprep.subr.bf16.mxu1 %v2157_v20  ;;  %v836_v9 = vmax.f32 %v804_v7, 0.0 }
 0x137   :  { %v1962_v58 = vpop.f32.mrf.mxu0 }
 0x138   :  { %v839_v40 = vmax.f32 %v807_v25, 0.0  ;;  %v805_v10 = vadd.f32 %v2522_v35, %v766_v0  ;;  %v771_v32 = vadd.f32 %v1962_v58, %v539_v34  ;;  %1992 = vmatprep.mubr.bf16.mxu1 %v2629_v57  ;;  %2053 = vmatmul.mubr.bf16.gmra.mxu0 %v2629_v57  ;;  %v2742_v58 = vmov 0  }
 0x139   :  { %v714_v12 = vpop.f32.mrf.mxu0  ;;  %2013 = vmatpush3.bf16.msra.mxu1 %v2157_v20 }
 0x13a   :  { %v837_v26 = vmax.f32 %v805_v10, 0.0  ;;  %v769_v14 = vadd.f32 %v714_v12, %v531_v42  ;;  %2014 = vmatprep.subr.bf16.mxu1 %v2158_v24  ;;  %v859_v11 = vpack.c.bf16 %v839_v40, %v838_v61  ;;  %v810_v15 = vadd.f32 %v2522_v35, %v771_v32 }
 0x13b   :  { %v1963_v33 = vpop.f32.mrf.mxu0 }
 0x13c   :  { %v858_v30 = vpack.c.bf16 %v837_v26, %v836_v9  ;;  %v772_v49 = vadd.f32 %v1963_v33, %v542_v36  ;;  %v808_v39 = vadd.f32 %v2522_v35, %v769_v14  ;;  %v842_v45 = vmax.f32 %v810_v15, 0.0 }
 0x13d   :  { %v717_v46 = vpop.f32.mrf.mxu0  ;;  %2015 = vmatpush3.bf16.msra.mxu1 %v2158_v24 }
 0x13e   :  { %v811_v17 = vadd.f32 %v2522_v35, %v772_v49  ;;  %v770_v2 = vadd.f32 %v717_v46, %v534_v44  ;;  %v869_v51 = vmax.bf16 %v859_v11, %v858_v30  ;;  %v840_v60 = vmax.f32 %v808_v39, 0.0 }
 0x13f   :  { %v1966_v48 = vpop.f32.mrf.mxu0 }
 0x140   :  { %v843_v16 = vmax.f32 %v811_v17, 0.0  ;;  %v809_v31 = vadd.f32 %v2522_v35, %v770_v2  ;;  %v775_v1 = vadd.f32 %v1966_v48, %v555_v63  ;;  %1993 = vmatmul.mubr.bf16.gmra.mxu1 %v869_v51  ;;  %2056 = vmatprep.mubr.bf16.mxu0 %v869_v51 }
 0x141   :  { %v730_v43 = vpop.f32.mrf.mxu0 }
 0x142   :  { %v861_v55 = vpack.c.bf16 %v843_v16, %v842_v45  ;;  %v841_v56 = vmax.f32 %v809_v31, 0.0  ;;  %v773_v3 = vadd.f32 %v730_v43, %v547_v4  ;;  %v814_v62 = vadd.f32 %v2522_v35, %v775_v1  ;;  %v2676_v4 = vld [vmem:[%s2732_s4] ss:$0 sm:$0xff]  ;;  %s2709_s4 = smov 0  }
 0x143   :  { %v1967_v21 = vpop.f32.mrf.mxu0 }
 0x144   :  { %v860_v52 = vpack.c.bf16 %v841_v56, %v840_v60  ;;  %v776_v20 = vadd.f32 %v1967_v21, %v558_v19  ;;  %v812_v27 = vadd.f32 %v2522_v35, %v773_v3  ;;  %v846_v34 = vmax.f32 %v814_v62, 0.0 }
 0x145   :  { %v733_v8 = vpop.f32.mrf.mxu0 }
 0x146   :  { %v815_v5 = vadd.f32 %v2522_v35, %v776_v20  ;;  %v774_v23 = vadd.f32 %v733_v8, %v550_v37  ;;  %v870_v22 = vmax.bf16 %v861_v55, %v860_v52  ;;  %v844_v29 = vmax.f32 %v812_v27, 0.0 }
 0x148   :  { %v847_v54 = vmax.f32 %v815_v5, 0.0  ;;  %v813_v28 = vadd.f32 %v2522_v35, %v774_v23  ;;  %1996 = vmatprep.mubr.bf16.mxu1 %v870_v22  ;;  %2057 = vmatmul.mubr.bf16.gmra.mxu0 %v870_v22 }
 0x14a   :  { %v863_v7 = vpack.c.bf16 %v847_v54, %v846_v34  ;;  %v845_v25 = vmax.f32 %v813_v28, 0.0 }
 0x14c   :  { %v862_v0 = vpack.c.bf16 %v845_v25, %v844_v29 }
 0x14e   :  { %v871_v24 = vmax.bf16 %v863_v7, %v862_v0 }
 0x150   :  { %1997 = vmatmul.mubr.bf16.gmra.mxu1 %v871_v24  ;;  %2060 = vmatprep.mubr.bf16.mxu0 %v871_v24 }
 0x151   :  { %2016 = vmatprep.mubr.bf16.mxu1 %v2742_v58  ;;  %2061 = vmatmul.mubr.bf16.gmra.mxu0 %v2742_v58 }
 0x158   :  { %2017 = vmatmul.mubr.bf16.vlgmr.msra.gmra.mxu1 %v2539_v6 }
 0x159   :  { %2020 = vmatprep.mubr.bf16.mxu1 %v2554_v38 }
 0x160   :  { %2021 = vmatmul.mubr.bf16.gmra.mxu1 %v2583_v47 }
 0x161   :  { %2024 = vmatprep.mubr.bf16.mxu1 %v2605_v53 }
 0x168   :  { %2025 = vmatmul.mubr.bf16.gmra.mxu1 %v2629_v57 }
 0x169   :  { %2028 = vmatprep.mubr.bf16.mxu1 %v869_v51 }
 0x170   :  { %2029 = vmatmul.mubr.bf16.gmra.mxu1 %v870_v22 }
 0x1e0   :  { %v1986_v35 = vpop.f32.mrf.mxu1 }
 0x1e2   :  { %v987_v42 = vpop.f32.mrf.mxu1 }
 0x1e4   :  { %v1987_v40 = vpop.f32.mrf.mxu1 }
 0x1e6   :  { %v990_v10 = vpop.f32.mrf.mxu1 }
 0x1e8   :  { %v2050_v61 = vpop.f32.mrf.mxu0 }
 0x1ea   :  { %v1294_v9 = vpop.f32.mrf.mxu0 }
 0x1ec   :  { %v2051_v47 = vpop.f32.mrf.mxu0 }
 0x1ee   :  { %v1297_v53 = vpop.f32.mrf.mxu0 }
 0x1f0   :  { %v1990_v32 = vpop.f32.mrf.mxu1 }
 0x1f2   :  { %v1003_v36 = vpop.f32.mrf.mxu1 }
 0x1f4   :  { %v1991_v59 = vpop.f32.mrf.mxu1 }
 0x1f6   :  { %v1006_v12 = vpop.f32.mrf.mxu1 }
 0x1f8   :  { %v2054_v14 = vpop.f32.mrf.mxu0 }
 0x1fa   :  { %v1310_v11 = vpop.f32.mrf.mxu0 }
 0x1fc   :  { %v2055_v49 = vpop.f32.mrf.mxu0 }
 0x1fe   :  { %v1313_v17 = vpop.f32.mrf.mxu0 }
 0x200   :  { %v1994_v6 = vpop.f32.mrf.mxu1 }
 0x202   :  { %v2659_v38 = vpop.f32.mrf.mxu1 }
 0x204   :  { %v2661_v26 = vpop.f32.mrf.mxu1 }
 0x206   :  { %v2663_v57 = vpop.f32.mrf.mxu1 }
 0x208   :  { %v2058_v16 = vpop.f32.mrf.mxu0 }
 0x20a   :  { %v1326_v3 = vpop.f32.mrf.mxu0 }
 0x20c   :  { %v2059_v22 = vpop.f32.mrf.mxu0 }
 0x210   :  { %v2665_v44 = vpop.f32.mrf.mxu1 }
 0x212   :  { %v2667_v33 = vpop.f32.mrf.mxu1 }
 0x214   :  { %v2669_v30 = vpop.f32.mrf.mxu1 }
 0x216   :  { %v2671_v15 = vpop.f32.mrf.mxu1 }
 0x218   :  { %v2018_v63 = vpop.f32.mrf.mxu1 }
 0x219   :  { %v1141_v13 = vadd.f32 %v2018_v63, %v1986_v35 }
 0x21a   :  { %v1132_v46 = vpop.f32.mrf.mxu1 }
 0x21b   :  { %v1133_v39 = vadd.f32 %v1132_v46, %v987_v42  ;;  %v1359_v2 = vadd.f32 %v2050_v61, %v1141_v13 }
 0x21c   :  { %v2019_v51 = vpop.f32.mrf.mxu1 }
 0x21d   :  { %v1357_v48 = vadd.f32 %v1294_v9, %v1133_v39  ;;  %v1144_v45 = vadd.f32 %v2019_v51, %v1987_v40  ;;  %v1382_v19 = vadd.f32 %v2676_v4, %v1359_v2 }
 0x21e   :  { %v1135_v31 = vpop.f32.mrf.mxu1 }
 0x21f   :  { %v1360_v1 = vadd.f32 %v2051_v47, %v1144_v45  ;;  %v1136_v50 = vadd.f32 %v1135_v31, %v990_v10  ;;  %v1380_v43 = vadd.f32 %v2676_v4, %v1357_v48  ;;  %v1398_v8 = vmax.f32 %v1382_v19, 0.0  ;;  %v1329_v10 = vpop.f32.mrf.mxu0 }
 0x220   :  { %v2022_v41 = vpop.f32.mrf.mxu1 }
 0x221   :  { %v1383_v60 = vadd.f32 %v2676_v4, %v1360_v1  ;;  %v1358_v55 = vadd.f32 %v1297_v53, %v1136_v50  ;;  %v1157_v56 = vadd.f32 %v2022_v41, %v1990_v32  ;;  %v1396_v27 = vmax.f32 %v1380_v43, 0.0 }
 0x222   :  { %v1148_v21 = vpop.f32.mrf.mxu1 }
 0x223   :  { %v1399_v18 = vmax.f32 %v1383_v60, 0.0  ;;  %v1381_v37 = vadd.f32 %v2676_v4, %v1358_v55  ;;  %v1149_v52 = vadd.f32 %v1148_v21, %v1003_v36  ;;  %v1363_v62 = vadd.f32 %v2054_v14, %v1157_v56 }
 0x224   :  { %v2023_v20 = vpop.f32.mrf.mxu1 }
 0x225   :  { %v1397_v5 = vmax.f32 %v1381_v37, 0.0  ;;  %v1361_v23 = vadd.f32 %v1310_v11, %v1149_v52  ;;  %v1160_v34 = vadd.f32 %v2023_v20, %v1991_v59  ;;  %v1413_v28 = vpack.c.bf16 %v1399_v18, %v1398_v8  ;;  %v2062_v11 = vpop.f32.mrf.mxu0 }
 0x226   :  { %v1151_v54 = vpop.f32.mrf.mxu1  ;;  %v1386_v25 = vadd.f32 %v2676_v4, %v1363_v62 }
 0x227   :  { %v1412_v29 = vpack.c.bf16 %v1397_v5, %v1396_v27  ;;  %v1152_v7 = vadd.f32 %v1151_v54, %v1006_v12  ;;  %v1364_v0 = vadd.f32 %v2055_v49, %v1160_v34  ;;  %v1384_v35 = vadd.f32 %v2676_v4, %v1361_v23 }
 0x228   :  { %v2026_v24 = vpop.f32.mrf.mxu1 }
 0x229   :  { %v1420_v58 = vmax.bf16 %v1413_v28, %v1412_v29  ;;  %v1362_v42 = vadd.f32 %v1313_v17, %v1152_v7  ;;  %v1173_v40 = vadd.f32 %v2026_v24, %v1994_v6  ;;  %v1387_v32 = vadd.f32 %v2676_v4, %v1364_v0 }
 0x22a   :  { %v1164_v36 = vpop.f32.mrf.mxu1  ;;  %v1402_v6 = vmax.f32 %v1386_v25, 0.0  ;;  %v1400_v49 = vmax.f32 %v1384_v35, 0.0 }
 0x22b   :  { %v1732_v61 = vcombine.low %v1420_v58, %v1420_v58  ;;  %v1733_v59 = vcombine.high %v1420_v58, %v1420_v58  ;;  %v1385_v9 = vadd.f32 %v2676_v4, %v1362_v42  ;;  %v1403_v47 = vmax.f32 %v1387_v32, 0.0 }
 0x22c   :  { %v1367_v12 = vadd.f32 %v2058_v16, %v1173_v40  ;;  %v1165_v53 = vadd.f32 %v1164_v36, %v2659_v38  ;;  %v2027_v14 = vpop.f32.mrf.mxu1  ;;  %v1342_v16 = vpop.f32.mrf.mxu0 }
 0x22d   :  { %1453 = vst.msk [vmem:[#allocation2] sm:$0xf] %vm1452_vm1, %v1732_v61  ;;  %1454 = vst.msk [vmem:[#allocation2 + $0x4] sm:$0xf] %vm1452_vm1, %v1733_v59  ;;  %v1401_v63 = vmax.f32 %v1385_v9, 0.0  ;;  %v1176_v13 = vadd.f32 %v2027_v14, %v2661_v26  ;;  %v1415_v17 = vpack.c.bf16 %v1403_v47, %v1402_v6  ;;  %v2220_v61 = vmov 0.0  }
 0x22e   :  { %v1365_v46 = vadd.f32 %v1326_v3, %v1165_v53  ;;  %v1167_v39 = vpop.f32.mrf.mxu1  ;;  %v1390_v38 = vadd.f32 %v2676_v4, %v1367_v12  ;;  %v2224_v59 = vmov 0.0  }
 0x22f   :  { %v1414_v2 = vpack.c.bf16 %v1401_v63, %v1400_v49  ;;  %v1368_v51 = vadd.f32 %v2059_v22, %v1176_v13  ;;  %v1168_v48 = vadd.f32 %v1167_v39, %v2663_v57  ;;  %v2063_v57 = vpop.f32.mrf.mxu0 }
 0x230   :  { %v1388_v45 = vadd.f32 %v2676_v4, %v1365_v46  ;;  %v2030_v31 = vpop.f32.mrf.mxu1  ;;  %v1406_v37 = vmax.f32 %v1390_v38, 0.0 }
 0x231   :  { %v1421_v1 = vmax.bf16 %v1415_v17, %v1414_v2  ;;  %v1391_v50 = vadd.f32 %v2676_v4, %v1368_v51  ;;  %v1366_v19 = vadd.f32 %v1329_v10, %v1168_v48  ;;  %v1189_v41 = vadd.f32 %v2030_v31, %v2665_v44 }
 0x232   :  { %v1180_v26 = vpop.f32.mrf.mxu1  ;;  %v1404_v52 = vmax.f32 %v1388_v45, 0.0 }
 0x233   :  { %v1734_v43 = vcombine.low %v1421_v1, %v1421_v1  ;;  %v1735_v60 = vcombine.high %v1421_v1, %v1421_v1  ;;  %v1407_v55 = vmax.f32 %v1391_v50, 0.0  ;;  %v1389_v56 = vadd.f32 %v2676_v4, %v1366_v19 }
 0x234   :  { %v1371_v3 = vadd.f32 %v2062_v11, %v1189_v41  ;;  %v1181_v21 = vadd.f32 %v1180_v26, %v2667_v33  ;;  %v2031_v18 = vpop.f32.mrf.mxu1  ;;  %v1345_v33 = vpop.f32.mrf.mxu0 }
 0x235   :  { %1455 = vst.msk [vmem:[#allocation2 + $0x8] sm:$0xf] %vm1452_vm1, %v1734_v43  ;;  %1456 = vst.msk [vmem:[#allocation2 + $0xc] sm:$0xf] %vm1452_vm1, %v1735_v60  ;;  %v1405_v62 = vmax.f32 %v1389_v56, 0.0  ;;  %v1192_v44 = vadd.f32 %v2031_v18, %v2669_v30  ;;  %v1417_v27 = vpack.c.bf16 %v1407_v55, %v1406_v37 }
 0x236   :  { %v1369_v20 = vadd.f32 %v1342_v16, %v1181_v21  ;;  %v1183_v8 = vpop.f32.mrf.mxu1  ;;  %v1394_v34 = vadd.f32 %v2676_v4, %v1371_v3 }
 0x237   :  { %v1416_v5 = vpack.c.bf16 %v1405_v62, %v1404_v52  ;;  %v1372_v23 = vadd.f32 %v2063_v57, %v1192_v44  ;;  %v1184_v22 = vadd.f32 %v1183_v8, %v2671_v15 }
 0x238   :  { %v1392_v28 = vadd.f32 %v2676_v4, %v1369_v20  ;;  %v1410_v58 = vmax.f32 %v1394_v34, 0.0 }
 0x239   :  { %v1422_v54 = vmax.bf16 %v1417_v27, %v1416_v5  ;;  %v1395_v29 = vadd.f32 %v2676_v4, %v1372_v23  ;;  %v1370_v7 = vadd.f32 %v1345_v33, %v1184_v22 }
 0x23a   :  { %v1408_v15 = vmax.f32 %v1392_v28, 0.0 }
 0x23b   :  { %v1736_v25 = vcombine.low %v1422_v54, %v1422_v54  ;;  %v1737_v0 = vcombine.high %v1422_v54, %v1422_v54  ;;  %v1411_v24 = vmax.f32 %v1395_v29, 0.0  ;;  %v1393_v30 = vadd.f32 %v2676_v4, %v1370_v7 }
 0x23d   :  { %1457 = vst.msk [vmem:[#allocation2 + $0x10] sm:$0xf] %vm1452_vm1, %v1736_v25  ;;  %1458 = vst.msk [vmem:[#allocation2 + $0x14] sm:$0xf] %vm1452_vm1, %v1737_v0  ;;  %v1409_v35 = vmax.f32 %v1393_v30, 0.0  ;;  %v1419_v42 = vpack.c.bf16 %v1411_v24, %v1410_v58 }
 0x23f   :  { %v1418_v40 = vpack.c.bf16 %v1409_v35, %v1408_v15 }
 0x241   :  { %v1423_v10 = vmax.bf16 %v1419_v42, %v1418_v40 }
 0x243   :  { %v1738_v32 = vcombine.low %v1423_v10, %v1423_v10  ;;  %v1739_v36 = vcombine.high %v1423_v10, %v1423_v10 }
 0x245   :  { %1459 = vst.msk [vmem:[#allocation2 + $0x18] sm:$0xf] %vm1452_vm1, %v1738_v32  ;;  %1460 = vst.msk [vmem:[#allocation2 + $0x1c] sm:$0xf] %vm1452_vm1, %v1739_v36 }
 0x246 LB: > { %v2236_v4 = vmov 0.0   ;;  %vm2237_vm2 = vmmov 0   ;;  %s1752_s0 = sshll.u32 %s2230_s4, 5  ;;  %s1751_s18 = sshll.u32 %s2230_s4, 3  ;;  %vm1514_vm3 = vcmask 523264   ;;  %s2230_s4 = sphi %s2709_s4, %s1466_s4   ;;  %v2226_v59 = vphi %v2224_v59, %v2225_v59   ;;  %v2222_v61 = vphi %v2220_v61, %v2221_v61  }
 0x247   : > { %2064 = vmatprep.subr.bf16.mxu0 %v2236_v4  ;;  %2072 = vmatprep.mubr.msk.bf16.mxu0 %vm2237_vm2, %v2236_v4  ;;  %s1476_s17 = scalar_lea.vmem %s2733_s5, %s1752_s0  ;;  %s1471_s19 = scalar_lea.vmem [#allocation2], %s1751_s18 }
 0x248   : > { %v2159_v9 = vld [vmem:[%s1476_s17 + $0x18] sm:$0xff]   ;;  %v2160_v47 = vld [vmem:[%s1476_s17 + $0x10] sm:$0xff]   ;;  %v2161_v12 = vld [vmem:[%s1476_s17 + $0x8] sm:$0xff]   ;;  %s1466_s4 = sadd.s32 1, %s2230_s4  }
 0x249   : > { %2065 = vmatpush3.bf16.msra.mxu0 %v2159_v9  ;;  %v2162_v53 = vld [vmem:[%s1476_s17] sm:$0xff]   ;;  %p1463_p5 = scmp.ge.s32.totalorder %s1466_s4, 4  }
 0x24a   : > { %2066 = vmatprep.subr.bf16.mxu0 %v2236_v4  ;;  %v1750_v39 = vld [vmem:[%s2734_s6] ss:$0 sm:$0xff] (%p1463_p5)  ;;  %s2238_s22 = smov (%p1463_p5), [#allocation6]  }
 0x24b   :  { %s1577_s23 = sshll.u32 (%p1463_p5), %s2238_s22, 4  ;;  %s1578_s23 = int_to_ptr.vmem [resolvable:$true] %s1577_s23 }
 0x24c   : > { %v2163_v14 = vld [vmem:[%s1471_s19] sm:$0xff]   ;;  %s2184_s24 = scalar_lea.vmem (%p1463_p5), %s1578_s23, 256  ;;  %p2189_p7 = scmp.lt.s32.totalorder (%p1463_p5), %s1578_s23, %s1578_s23 }
 0x24d   : > { %2067 = vmatpush3.bf16.msra.mxu0 %v2160_v47  ;;  %p2185_p6 = scmp.ne.s32.totalorder (%p1463_p5), %s1578_s23, %s2184_s24  ;;  %p2190_p8 = scmp.lt.s32.totalorder (%p1463_p5), %s2184_s24, %s2184_s24 }
 0x24e   : > { %2068 = vmatprep.subr.bf16.mxu0 %v2236_v4 }
 0x24f   :  { %p2191_p9 = por (%p1463_p5), %p2190_p8, %p2189_p7 }
 0x251   : > { %2069 = vmatpush3.bf16.msra.mxu0 %v2161_v12  ;;  %p2192_p10 = pnand (%p1463_p5), %p2191_p9, %p2185_p6 }
 0x252   : > { %2070 = vmatprep.subr.bf16.mxu0 %v2236_v4 }
 0x255   : > { %2071 = vmatpush3.bf16.msra.mxu0 %v2162_v53 }
 0x258   : > { %2073 = vmatmul.mubr.msk.bf16.vlgmr.msra.gmra.mxu0 %vm1514_vm3, %v2163_v14 }
 0x318   : > { %v1552_v11 = vpop.f32.mrf.mxu0 }
 0x319   : > { %v1559_v6 = vadd.f32 %v2226_v59, %v1552_v11  }
 0x31a   : > { %v2074_v49 = vpop.f32.mrf.mxu0 }
 0x31b   : > { %v2225_v59 = vmov %v1559_v6   ;;  %1465 = sbr.rel (!%p1463_p5) target bundleno = 582 (0x246), region = 65  ;;  %v1568_v17 = vadd.f32 (%p1463_p5), %v1750_v39, %v1559_v6 }
 0x31c   : > { %v1555_v63 = vpop.f32.mrf.mxu0 }
 0x31d   : > { %v1560_v13 = vadd.f32 %v2222_v61, %v1555_v63   ;;  %1570 = vst [vmem:[#allocation6] sm:$0xff] (%p1463_p5), %v1568_v17 }
 0x31e   : > { %v2075_v46 = vpop.f32.mrf.mxu0 }
 0x31f   : > { %v2221_v61 = vmov %v1560_v13   ;;  %v1569_v2 = vadd.f32 (%p1463_p5), %v1750_v39, %v1560_v13 }
 0x321   :  { %1571 = vst [vmem:[#allocation6 + $0x8] sm:$0xff] %v1569_v2 }
 0x322   :  { %2195 = shalt.err (!%p2192_p10)
}
 0x323   :  { %s2239_s2 = smov 128   ;;  %s2240_s25 = smov 8  }
 0x324   :  { %1583 = dma.vmem_to_hbm [thread:$0]  %s1578_s23, 256, %s2735_s7, [#allocation5], %s2239_s2, %s2239_s2, %s2240_s25  }
 0x325   :  { %2218 = dma.done.wait [#allocation5], 256  }
 0x326   :  { %2219 = vsyncadd [#allocation5], 4294967040 }
 0x327   :  { %1587 = vsyncpa [#allocation4], 1 }
 0x328   :  { %1588 = vsyncpa [#allocation5], 1 }

</bundles_post_ra>
